<compile_context>
chip_gen: v5e
topology: v5e:2x2
jax: 0.10.0
libtpu: 0.0.40
codegen_flags: <defaults>
</compile_context>

<pallas_src>
import functools

import jax
import jax.numpy as jnp
from jax import lax
from jax.experimental import pallas as pl
from jax.experimental.pallas import tpu as pltpu

_BN_EPS = 1e-5


def _bn_act(y, gb, ifend):
    """Training-mode BatchNorm1d (+ ReLU / Sigmoid) on an f32 tile.

    y  : (B, n) f32 linear output (full batch!)
    gb : (2, n) f32, row 0 = gamma, row 1 = beta
    """
    mean = jnp.mean(y, axis=0, keepdims=True)
    # E[y^2] - mean^2 avoids materializing a centered copy (lower vreg
    # pressure); clamp for the (tiny) cancellation risk.
    var = jnp.maximum(jnp.mean(y * y, axis=0, keepdims=True) - mean * mean, 0.0)
    scale = gb[0:1, :] * lax.rsqrt(var + _BN_EPS)     # rsqrt -> EUP slot
    shift = gb[1:2, :] - mean * scale
    z = y * scale + shift
    return jax.nn.sigmoid(z) if ifend else jnp.maximum(z, 0.0)


def _block_kernel_single(x_ref, w_ref, gb_ref, o_ref, *, ifend):
    """Fast path: whole problem in VMEM, one invocation, no grid."""
    y = jnp.dot(x_ref[...], w_ref[...], preferred_element_type=jnp.float32)
    o_ref[...] = _bn_act(y, gb_ref[...], ifend).astype(o_ref.dtype)


def _block_kernel_tiled(x_ref, w_ref, gb_ref, o_ref, *acc, ifend, tk):
    """One (n, k) grid step.

    x_ref  : (B, num_in) bf16, resident (constant index_map), sliced by k
    w_ref  : (tk, tn)    bf16 pre-transposed weight tile
    gb_ref : (2, tn)     f32 fused gamma/beta slice
    o_ref  : (B, tn)     output tile (resident across k)
    acc    : optional (B, tn) f32 scratch; empty when the output dtype is f32
             (then we accumulate directly into o_ref).
    """
    acc_ref = acc[0] if acc else o_ref
    k = pl.program_id(1)

    @pl.when(k == 0)
    def _():
        acc_ref[...] = jnp.zeros_like(acc_ref)

    x_blk = x_ref[:, pl.ds(pl.multiple_of(k * tk, tk), tk)]
    acc_ref[...] += jnp.dot(x_blk, w_ref[...],
                            preferred_element_type=jnp.float32)

    @pl.when(k == pl.num_programs(1) - 1)
    def _():
        o_ref[...] = _bn_act(acc_ref[...], gb_ref[...], ifend).astype(o_ref.dtype)


def make_block_params(weight, gamma, beta):
    """One-time parameter setup (persistent layouts; never redone per call).

    weight : (num_out, num_in) nn.Linear weight (PyTorch layout)
    gamma  : (num_out,) BatchNorm1d weight
    beta   : (num_out,) BatchNorm1d bias

    Returns:
      w_t : (num_in, num_out) bf16 — pre-transposed + pre-cast once.
      gb  : (2, num_out) f32 — gamma/beta fused into a single array.

    The Linear bias is intentionally dropped: under training-mode BatchNorm
    the batch-mean subtraction cancels it exactly.
    """
    w_t = jnp.asarray(weight).T.astype(jnp.bfloat16)
    gb = jnp.stack([jnp.asarray(gamma, jnp.float32),
                    jnp.asarray(beta, jnp.float32)], axis=0)
    return w_t, gb


def _pick_tile(dim, candidates, prefer_even_count=False):
    """Largest candidate evenly dividing `dim` (full dim as fallback)."""
    if prefer_even_count:
        # Mild v7x megacore preference: even number of N tiles, tile >= 256.
        for c in candidates:
            if c >= 256 and dim >= c and dim % c == 0 and (dim // c) % 2 == 0:
                return c
    for c in candidates:
        if dim >= c and dim % c == 0:
            return c
    return dim


def block_forward(x, w_t, gb, *, ifend,
                  tn_candidates=(512, 256, 128),
                  tk_candidates=(2048, 1024, 512, 256, 128),
                  single_block_bytes_max=8 * 1024 * 1024):
    """Forward pass of `block`.

    x   : (B, num_in)
    w_t : (num_in, num_out) bf16 weight from make_block_params
    gb  : (2, num_out) f32 fused gamma/beta from make_block_params
    """
    B, num_in = x.shape
    num_out = w_t.shape[1]
    out_dtype = x.dtype
    out_itemsize = jnp.dtype(out_dtype).itemsize

    # bf16 activations halve the x DMA and feed the MXU natively; the matmul
    # still accumulates in f32.
    x_lo = x.astype(jnp.bfloat16)

    cost = pl.CostEstimate(
        flops=2 * B * num_in * num_out,
        transcendentals=num_out + (B * num_out if ifend else 0),
        bytes_accessed=(2 * B * num_in + 2 * num_in * num_out
                        + 4 * 2 * num_out + out_itemsize * B * num_out),
    )

    # ---------------- single-block fast path --------------------------------
    resident_bytes = (2 * B * num_in + 2 * num_in * num_out
                      + 4 * 2 * num_out + out_itemsize * B * num_out)
    if resident_bytes <= single_block_bytes_max:
        vmem_limit = int(min(max(2 * (resident_bytes + 4 * B * num_out)
                                 + (4 << 20), 16 << 20), 40 << 20))
        return pl.pallas_call(
            functools.partial(_block_kernel_single, ifend=ifend),
            out_shape=jax.ShapeDtypeStruct((B, num_out), out_dtype),
            compiler_params=pltpu.CompilerParams(vmem_limit_bytes=vmem_limit),
            cost_estimate=cost,
        )(x_lo, w_t, gb)

    # ---------------- tiled path ---------------------------------------------
    tn = _pick_tile(num_out, tn_candidates, prefer_even_count=True)
    tk = _pick_tile(num_in, tk_candidates)
    grid = (num_out // tn, num_in // tk)          # reduction (k) axis last

    use_scratch = out_dtype != jnp.float32
    scratch_shapes = [pltpu.VMEM((B, tn), jnp.float32)] if use_scratch else []

    vmem_needed = (2 * B * num_in                  # resident bf16 x
                   + 2 * (2 * tk * tn)             # double-buffered bf16 w tile
                   + 2 * (4 * 2 * tn)              # gamma/beta tiles
                   + 2 * out_itemsize * B * tn     # output tile
                   + (4 * B * tn if use_scratch else 0))
    vmem_limit = int(min(max(2 * vmem_needed, 16 << 20), 40 << 20))

    kernel = functools.partial(_block_kernel_tiled, ifend=ifend, tk=tk)

    return pl.pallas_call(
        kernel,
        out_shape=jax.ShapeDtypeStruct((B, num_out), out_dtype),
        grid_spec=pltpu.PrefetchScalarGridSpec(
            num_scalar_prefetch=0,
            grid=grid,
            in_specs=[
                pl.BlockSpec((B, num_in), lambda n, k: (0, 0)),   # x, resident
                pl.BlockSpec((tk, tn), lambda n, k: (k, n)),      # w_t
                pl.BlockSpec((2, tn), lambda n, k: (0, n)),       # gamma/beta
            ],
            out_specs=pl.BlockSpec((B, tn), lambda n, k: (0, n)),
            scratch_shapes=scratch_shapes,
        ),
        compiler_params=pltpu.CompilerParams(
            # Per-feature BN makes N tiles independent -> megacore-parallel on
            # v7x; K is the resident-accumulator reduction axis.
            dimension_semantics=("parallel", "arbitrary"),
            vmem_limit_bytes=vmem_limit,
        ),
        cost_estimate=cost,
    )(x_lo, w_t, gb)


def _reference(x, weight, bias, gamma, beta, ifend):
    # Faithful to the PyTorch module (including the Linear bias).
    y = x @ weight.T + bias
    mean = jnp.mean(y, axis=0, keepdims=True)
    var = jnp.mean((y - mean) ** 2, axis=0, keepdims=True)
    z = (y - mean) / jnp.sqrt(var + _BN_EPS) * gamma + beta
    return jax.nn.sigmoid(z) if ifend else jnp.maximum(z, 0.0)


if __name__ == "__main__":
    # TODO(synk): BatchNorm1d running_mean/running_var buffer updates (a
    # training-mode side effect) are not reproduced; the forward output in
    # training mode does not depend on them.
    key = jax.random.PRNGKey(0)
    ok = True

    # (B, num_in, num_out, force_tiled):
    #   * tiny layer      -> single-block fast path
    #   * 384x384         -> single-block fast path (fits easily in VMEM)
    #   * 384x384, forced -> exercises the (n, k) tiled grid + in-kernel pl.ds
    cases = [(8, 32, 32, False), (16, 384, 384, False), (16, 384, 384, True)]

    for (B, num_in, num_out, force_tiled) in cases:
        key, k_x, k_w, k_b, k_g, k_be = jax.random.split(key, 6)
        x = jax.random.normal(k_x, (B, num_in), dtype=jnp.float32)

        bound = 1.0 / (num_in ** 0.5)          # mimic nn.Linear init bounds
        weight = jax.random.uniform(k_w, (num_out, num_in), jnp.float32,
                                    -bound, bound)
        bias = jax.random.uniform(k_b, (num_out,), jnp.float32, -bound, bound)
        gamma = jax.random.uniform(k_g, (num_out,), jnp.float32, 0.5, 1.5)
        beta = 0.1 * jax.random.normal(k_be, (num_out,), dtype=jnp.float32)

        # One-time parameter setup: transpose + bf16 cast + gamma/beta fuse.
        w_t, gb = make_block_params(weight, gamma, beta)

        for ifend in (False, True):
            out = block_forward(
                x, w_t, gb, ifend=ifend,
                single_block_bytes_max=0 if force_tiled else 8 * 1024 * 1024)
            out = jax.block_until_ready(out)
            ref = _reference(x, weight, bias, gamma, beta, ifend)
            # bf16 weight/activation streaming -> tolerance is looser than a
            # pure-f32 comparison (accuracy/perf tradeoff from the review).
            if not jnp.allclose(out, ref, atol=3e-2, rtol=3e-2):
                ok = False

    print("KERNEL_OK" if ok else "KERNEL_MISMATCH")
</pallas_src>

<mosaic_0001>
module attributes {stable_mosaic.version = 11 : i64} {
  func.func @_block_kernel_single(%arg0: memref<8x32xbf16, #tpu.memory_space<vmem>>, %arg1: memref<32x32xbf16, #tpu.memory_space<vmem>>, %arg2: memref<2x32xf32, #tpu.memory_space<vmem>>, %arg3: memref<8x32xf32, #tpu.memory_space<vmem>>) attributes {dimension_semantics = [], scalar_prefetch = 0 : i64, scratch_operands = 0 : i64, tpu.core_type = #tpu.core_type<tc>} {
    %c0 = arith.constant 0 : index
    %c0_0 = arith.constant 0 : index
    %0 = vector.load %arg0[%c0, %c0_0] : memref<8x32xbf16, #tpu.memory_space<vmem>>, vector<8x32xbf16>
    %c0_1 = arith.constant 0 : index
    %c0_2 = arith.constant 0 : index
    %1 = vector.load %arg1[%c0_1, %c0_2] : memref<32x32xbf16, #tpu.memory_space<vmem>>, vector<32x32xbf16>
    %cst = arith.constant dense<0.000000e+00> : vector<8x32xf32>
    %2 = tpu.matmul %0, %1, %cst {dimension_numbers = #tpu.dot_dimension_numbers<[1], [0], [0], [1], [0, 0, 1, 1], [], []>} : vector<8x32xbf16>, vector<32x32xbf16>, vector<8x32xf32> -> vector<8x32xf32>
    %c0_3 = arith.constant 0 : index
    %c0_4 = arith.constant 0 : index
    %3 = vector.load %arg2[%c0_3, %c0_4] : memref<2x32xf32, #tpu.memory_space<vmem>>, vector<2x32xf32>
    %cst_5 = arith.constant dense<0.000000e+00> : vector<32xf32>
    %4 = vector.multi_reduction <add>, %2, %cst_5 [0] : vector<8x32xf32> to vector<32xf32>
    %5 = vector.shape_cast %4 : vector<32xf32> to vector<1x32xf32>
    %cst_6 = arith.constant 8.000000e+00 : f32
    %6 = vector.broadcast %cst_6 : f32 to vector<1x32xf32>
    %7 = arith.divf %5, %6 : vector<1x32xf32>
    %8 = arith.mulf %2, %2 : vector<8x32xf32>
    %cst_7 = arith.constant dense<0.000000e+00> : vector<32xf32>
    %9 = vector.multi_reduction <add>, %8, %cst_7 [0] : vector<8x32xf32> to vector<32xf32>
    %10 = vector.shape_cast %9 : vector<32xf32> to vector<1x32xf32>
    %cst_8 = arith.constant 8.000000e+00 : f32
    %11 = vector.broadcast %cst_8 : f32 to vector<1x32xf32>
    %12 = arith.divf %10, %11 : vector<1x32xf32>
    %13 = arith.mulf %7, %7 : vector<1x32xf32>
    %14 = arith.subf %12, %13 : vector<1x32xf32>
    %cst_9 = arith.constant 0.000000e+00 : f32
    %15 = vector.broadcast %cst_9 : f32 to vector<1x32xf32>
    %16 = arith.maximumf %14, %15 : vector<1x32xf32>
    %17 = vector.extract_strided_slice %3 {offsets = [0, 0], sizes = [1, 32], strides = [1, 1]} : vector<2x32xf32> to vector<1x32xf32>
    %cst_10 = arith.constant 9.99999974E-6 : f32
    %18 = vector.broadcast %cst_10 : f32 to vector<1x32xf32>
    %19 = arith.addf %16, %18 : vector<1x32xf32>
    %20 = math.rsqrt %19 : vector<1x32xf32>
    %21 = arith.mulf %17, %20 : vector<1x32xf32>
    %22 = vector.extract_strided_slice %3 {offsets = [1, 0], sizes = [1, 32], strides = [1, 1]} : vector<2x32xf32> to vector<1x32xf32>
    %23 = arith.mulf %7, %21 : vector<1x32xf32>
    %24 = arith.subf %22, %23 : vector<1x32xf32>
    %25 = vector.broadcast %21 : vector<1x32xf32> to vector<8x32xf32>
    %26 = arith.mulf %2, %25 : vector<8x32xf32>
    %27 = vector.broadcast %24 : vector<1x32xf32> to vector<8x32xf32>
    %28 = arith.addf %26, %27 : vector<8x32xf32>
    %cst_11 = arith.constant 0.000000e+00 : f32
    %29 = vector.broadcast %cst_11 : f32 to vector<8x32xf32>
    %30 = arith.maximumf %28, %29 : vector<8x32xf32>
    %c0_12 = arith.constant 0 : index
    %c0_13 = arith.constant 0 : index
    %31 = vector.load %arg3[%c0_12, %c0_13] : memref<8x32xf32, #tpu.memory_space<vmem>>, vector<8x32xf32>
    tpu.vector_store %arg3[%c0_12, %c0_13], %30 {strides = array<i32>} : memref<8x32xf32, #tpu.memory_space<vmem>>, vector<8x32xf32>,
    return
  }
}

</mosaic_0001>

<bundles_post_ra>
// kernel: tpu_custom_call.1
= control target key start
LH: loop header
LB: loop body
LE: loop exit
PB: predicated region body
PF: predicated region fallthrough
CT: control target
= control target key end

     0   :  { %8 = vsyncpa [#allocation3], 0  ;;  %s329_s0 = inlined_call_operand.hbm [shape: bf16[8,32], index: 0, kind: input, shape index: {}]   ;;  %s330_s1 = inlined_call_operand.hbm [shape: bf16[32,32], index: 1, kind: input, shape index: {}]   ;;  %s331_s2 = inlined_call_operand.hbm [shape: f32[2,32], index: 2, kind: input, shape index: {}]   ;;  %s332_s3 = inlined_call_operand.hbm [shape: f32[8,32], index: 3, kind: output, shape index: {}]  }
   0x1   :  { %9 = vsyncpa [#allocation6], 0  ;;  %s26_s14 = sshll.u32 %s330_s1, 4  ;;  %s27_s14 = int_to_ptr.hbm [resolvable:$true] %s26_s14 }
   0x2   :  { %10 = vsyncpa [#allocation4], 0  ;;  %s286_s15 = smov [#allocation5]   ;;  %s16_s19 = sshll.u32 %s329_s0, 4  ;;  %s17_s19 = int_to_ptr.hbm [resolvable:$true] %s16_s19 }
   0x3   :  { %s28_s16 = sshll.u32 %s286_s15, 4  ;;  %s287_s20 = smov 64   ;;  %s29_s16 = int_to_ptr.vmem [resolvable:$true] %s28_s16 }
   0x4   :  { %s288_s21 = smov 4   ;;  %s289_s22 = smov [#allocation2]  }
   0x5   :  { %34 = dma.hbm_to_vmem [thread:$0]  %s27_s14, 256, %s29_s16, [#allocation6], %s287_s20, %s287_s20, %s288_s21  }
   0x6   :  { %s18_s23 = sshll.u32 %s289_s22, 4  ;;  %s40_s26 = sshll.u32 %s331_s2, 4  ;;  %s19_s23 = int_to_ptr.vmem [resolvable:$true] %s18_s23  ;;  %s41_s26 = int_to_ptr.hbm [resolvable:$true] %s40_s26 }
   0x7   :  { %21 = dma.hbm_to_vmem [thread:$0]  %s17_s19, 64, %s19_s23, [#allocation3]  }
   0x8   :  { %s290_s1 = smov [#allocation7]  }
   0x9   :  { %s42_s27 = sshll.u32 %s290_s1, 4  ;;  %s43_s27 = int_to_ptr.vmem [resolvable:$true] %s42_s27 }
   0xa   :  { %45 = dma.hbm_to_vmem [thread:$0]  %s41_s26, 32, %s43_s27, [#allocation6]  }
   0xb   :  { %280 = dma.done.wait [#allocation3], 64  }
   0xc   :  { %281 = vsyncadd [#allocation3], 4294967232 }
   0xd   :  { %282 = dma.done.wait [#allocation6], 288  }
   0xe   :  { %283 = vsyncadd [#allocation6], 4294967008  ;;  %v172_v0 = vld [vmem:[#allocation5 + $0x8] sm:$0xff]  ;;  %v171_v1 = vld [vmem:[#allocation5] sm:$0xff]  ;;  %vm76_vm0 = vcmask 261120   ;;  %v291_v3 = vmov 8.0  }
   0xf   :  { %86 = vmatpush.bf16.msra.mxu0 %v172_v0  ;;  %v59_v2 = vld [vmem:[#allocation2] sm:$0xf]  ;;  %180 = vrcp.f32 %v291_v3  ;;  %v93_v38 = vld [vmem:[#allocation7] sm:$0x3]  ;;  %s292_s0 = smov [#allocation8]   ;;  %s151_s30 = sshll.u32 %s332_s3, 4  ;;  %s152_s30 = int_to_ptr.hbm [resolvable:$true] %s151_s30 }
  0x10   :  { %s149_s2 = sshll.u32 %s292_s0, 4  ;;  %s150_s2 = int_to_ptr.vmem [resolvable:$true] %s149_s2 }
  0x13   :  { %87 = vmatpush.bf16.msra.mxu0 %v171_v1 }
  0x15   :  { %v181_v4 = vpop.eup %180 }
  0x16   :  { %170 = vmatmul.msk.bf16.vlgmr.msra.gmra.mxu0 %vm76_vm0, %v59_v2  ;;  %v102_v5 = vmul.f32 8.0, %v181_v4  ;;  %vm106_vm1 = vweird.f32 %v181_v4 }
  0x18   :  { %v103_v6 = vsub.f32 1.0, %v102_v5 }
  0x1a   :  { %v104_v11 = vmul.f32 %v181_v4, %v103_v6 }
  0x1c   :  { %v105_v17 = vadd.f32 %v181_v4, %v104_v11 }
  0x1e   :  { %v107_v23 = vsel %vm106_vm1, %v181_v4, %v105_v17 }
  0x93   :  { %v89_v7 = vpop.f32.mrf.mxu0 }
  0x94   :  { %v94_v8 = vsel %vm76_vm0, %v89_v7, 0.0  ;;  %v109_v9 = vmul.f32 %v89_v7, %v89_v7 }
  0x95   :  { %v95_v10 = vrot.slane %v94_v8, 4 }
  0x96   :  { %v110_v12 = vsel %vm76_vm0, %v109_v9, 0.0 }
  0x97   :  { %v96_v13 = vadd.f32 %v95_v10, %v94_v8  ;;  %v111_v14 = vrot.slane %v110_v12, 4 }
  0x99   :  { %v97_v15 = vrot.slane %v96_v13, 2  ;;  %v112_v16 = vadd.f32 %v111_v14, %v110_v12 }
  0x9b   :  { %v98_v18 = vadd.f32 %v97_v15, %v96_v13  ;;  %v113_v19 = vrot.slane %v112_v16, 2  ;;  %v91_v20 = vpop.f32.mrf.mxu0 }
  0x9d   :  { %v99_v21 = vrot.slane %v98_v18, 1  ;;  %v114_v22 = vadd.f32 %v113_v19, %v112_v16 }
  0x9f   :  { %v100_v24 = vadd.f32 %v99_v21, %v98_v18  ;;  %v115_v25 = vrot.slane %v114_v22, 1 }
  0xa1   :  { %v108_v26 = vmul.f32 %v107_v23, %v100_v24  ;;  %v116_v27 = vadd.f32 %v115_v25, %v114_v22 }
  0xa3   :  { %v117_v28 = vmul.f32 %v116_v27, %v107_v23  ;;  %v118_v29 = vmul.f32 %v108_v26, %v108_v26 }
  0xa5   :  { %v119_v30 = vsub.f32 %v117_v28, %v118_v29 }
  0xa7   :  { %v120_v31 = vmax.f32 %v119_v30, 0.0 }
  0xa9   :  { %v121_v32 = vadd.f32 1e-05, %v120_v31 }
  0xab   :  { %182 = vrsqrt.f32 %v121_v32  ;;  %vm128_vm3 = vweird.f32 %v121_v32 }
  0xb1   :  { %v183_v33 = vpop.eup %182 }
  0xb2   :  { %v123_v34 = vmul.f32 %v183_v33, %v121_v32  ;;  %vm129_vm2 = vweird.f32 %v183_v33 }
  0xb3   :  { %vm130_vm4 = vmor %vm128_vm3, %vm129_vm2 }
  0xb4   :  { %v124_v35 = vmul.f32 %v183_v33, %v123_v34 }
  0xb6   :  { %v125_v36 = vmul.f32 0.5, %v124_v35 }
  0xb8   :  { %v126_v37 = vsub.f32 1.5, %v125_v36 }
  0xba   :  { %v127_v39 = vmul.f32 %v183_v33, %v126_v37 }
  0xbc   :  { %v131_v40 = vsel %vm130_vm4, %v183_v33, %v127_v39 }
  0xbd   :  { %v132_v41 = vmul.f32 %v131_v40, %v93_v38 }
  0xbf   :  { %v133_v42 = vmul.f32 %v132_v41, %v108_v26  ;;  %v138_v44 = vperm.slane %v132_v41, 0 }
  0xc1   :  { %v135_v43 = vrot.slane %v133_v42, 7  ;;  %v139_v46 = vmul.f32 %v138_v44, %v89_v7 }
  0xc3   :  { %v137_v45 = vsub.f32 %v93_v38, %v135_v43 }
  0xc5   :  { %v140_v47 = vperm.slane %v137_v45, 1 }
  0xc7   :  { %v141_v48 = vadd.f32 %v140_v47, %v139_v46 }
  0xc9   :  { %v142_v49 = vmax.f32 %v141_v48, 0.0 }
  0xcb   :  { %143 = vst.msk [vmem:[#allocation8] sm:$0xff] %vm76_vm0, %v142_v49 }
  0xcc   :  { %154 = dma.vmem_to_hbm [thread:$0]  %s150_s2, 128, %s152_s30, [#allocation4]  }
  0xcd   :  { %284 = dma.done.wait [#allocation4], 128  }
  0xce   :  { %285 = vsyncadd [#allocation4], 4294967168 }
  0xcf   :  { %159 = vsyncpa [#allocation3], 1 }
  0xd0   :  { %160 = vsyncpa [#allocation6], 1 }
  0xd1   :  { %161 = vsyncpa [#allocation4], 1 }

</bundles_post_ra>
